<compile_context>
chip_gen: v7x
topology: tpu7x:2x2x1
jax: 0.10.0
libtpu: 0.0.40
codegen_flags: <defaults>
</compile_context>

<pallas_src>
import jax
import jax.numpy as jnp
from jax.experimental import pallas as pl
from jax.experimental.pallas import tpu as pltpu

INPUT_DIM = 3
NUM_HIDDEN_LAYERS = 8
HIDDEN_DIM = 32
OUTPUT_DIM = 1

MAX_BATCH_TILE = 2048   # per-grid-step batch tile (lanes)
LANE_CHUNK = 512        # in-kernel chunk: [32, 512] f32 live = 16 vregs


def _round_up(n, m):
    return ((n + m - 1) // m) * m


def _cdiv(a, b):
    return -(-a // b)


def _choose_tiling(batch):
    """Pick (tb, b_pad): tb is a multiple of 128, capped at MAX_BATCH_TILE, and
    chosen so the grid has >= 2 steps whenever batch allows it (v7x megacore;
    harmless on single-TC v5e/v6e)."""
    b128 = _round_up(max(batch, 1), 128)
    n_tiles = max(_cdiv(b128, MAX_BATCH_TILE), 2 if b128 >= 256 else 1)
    tb = _round_up(_cdiv(b128, n_tiles), 128)
    b_pad = tb * _cdiv(b128, tb)
    return tb, b_pad


def _make_kernel(tb):
    """Kernel for one [*, tb] batch tile; batch lives on the lane (last) axis.

    x_ref : [INPUT_DIM,  tb]  f32
    w0_ref: [HIDDEN_DIM, INPUT_DIM]             f32   (PyTorch [out, in] layout)
    b0_ref: [HIDDEN_DIM, 1]                     f32
    wh_ref: [L-1, HIDDEN_DIM, HIDDEN_DIM]       bf16  (MXU operands)
    bh_ref: [HIDDEN_DIM, L-1]                   f32   (lane-dense bias slab)
    wo_ref: [HIDDEN_DIM, OUTPUT_DIM]            f32
    bo_ref: [OUTPUT_DIM, 1]                     f32
    o_ref : [OUTPUT_DIM, tb]                    f32
    """
    chunk = min(LANE_CHUNK, tb)
    chunks = [(o, min(chunk, tb - o)) for o in range(0, tb, chunk)]

    def kernel(x_ref, w0_ref, b0_ref, wh_ref, bh_ref, wo_ref, bo_ref, o_ref):
        # Small resident operands (loaded once per grid step).
        w0 = w0_ref[...]   # [32, 3]  f32
        b0 = b0_ref[...]   # [32, 1]  f32
        bh = bh_ref[...]   # [32, 7]  f32  (4 dense vregs)
        wo = wo_ref[...]   # [32, 1]  f32
        bo = bo_ref[...]   # [1, 1]   f32

        def layer0(o, c):
            # K=3: VPU broadcast multiply-adds instead of a sliver MXU matmul.
            xc = x_ref[:, o:o + c]                            # [3, c] f32
            acc = (w0[:, 0:1] * xc[0:1, :]
                   + w0[:, 1:2] * xc[1:2, :]
                   + w0[:, 2:3] * xc[2:3, :])
            return jnp.maximum(acc + b0, 0.0)                 # [32, c] f32

        # Walk the tile in 512-lane chunks, two at a time: two independent
        # dependence chains let the scheduler overlap MXU drain of one chunk
        # with the VPU bias+ReLU of the other.
        for p in range(0, len(chunks), 2):
            group = chunks[p:p + 2]
            hs = [layer0(o, c) for (o, c) in group]

            # Seven hidden layers on the MXU: bf16 operands, f32 accumulate.
            for i in range(NUM_HIDDEN_LAYERS - 1):
                w_i = wh_ref[i]                               # [32, 32] bf16
                b_i = bh[:, i:i + 1]                          # [32, 1]  f32
                pre = [jnp.dot(w_i, h.astype(jnp.bfloat16),
                               preferred_element_type=jnp.float32)
                       for h in hs]                           # both dots first
                hs = [jnp.maximum(d + b_i, 0.0) for d in pre]

            # Output layer (M=1): broadcast-mul + sublane reduce, sigmoid on EUP.
            for h, (o, c) in zip(hs, group):
                logit = jnp.sum(h * wo, axis=0, keepdims=True) + bo
                o_ref[:, o:o + c] = jax.nn.sigmoid(logit)     # lane-dense store

    return kernel


def _forward_feature_major(x_t, w0, b0, wh, bh, wo, bo):
    """Feature-major forward: x_t [INPUT_DIM, batch] -> [OUTPUT_DIM, batch]."""
    batch = x_t.shape[1]
    tb, b_pad = _choose_tiling(batch)
    grid = (b_pad // tb,)

    if b_pad != batch:
        # Zero-pad the batch lanes; padded lanes are sliced off below (no
        # in-kernel reduction over batch, so their contents never matter).
        x_t = jnp.pad(x_t, ((0, 0), (0, b_pad - batch)))

    # bf16 MXU operands for the hidden layers (single MXU pass per dot).
    wh_bf16 = wh.astype(jnp.bfloat16)

    n_weight_elems = (HIDDEN_DIM * INPUT_DIM + HIDDEN_DIM
                      + (NUM_HIDDEN_LAYERS - 1) * (HIDDEN_DIM * HIDDEN_DIM + HIDDEN_DIM)
                      + HIDDEN_DIM * OUTPUT_DIM + OUTPUT_DIM)
    cost = pl.CostEstimate(
        flops=2 * b_pad * (INPUT_DIM * HIDDEN_DIM
                           + (NUM_HIDDEN_LAYERS - 1) * HIDDEN_DIM * HIDDEN_DIM
                           + HIDDEN_DIM * OUTPUT_DIM),
        transcendentals=b_pad,  # sigmoid
        bytes_accessed=4 * b_pad * (INPUT_DIM + OUTPUT_DIM) + 4 * n_weight_elems,
    )

    out_t = pl.pallas_call(
        _make_kernel(tb),
        out_shape=jax.ShapeDtypeStruct((OUTPUT_DIM, b_pad), jnp.float32),
        grid=grid,
        in_specs=[
            # Activations: tiled along the batch (lane) axis.
            pl.BlockSpec((INPUT_DIM, tb), lambda i: (0, i)),
            # Weights / biases: constant index_map -> resident across grid steps.
            pl.BlockSpec((HIDDEN_DIM, INPUT_DIM), lambda i: (0, 0)),
            pl.BlockSpec((HIDDEN_DIM, 1), lambda i: (0, 0)),
            pl.BlockSpec((NUM_HIDDEN_LAYERS - 1, HIDDEN_DIM, HIDDEN_DIM),
                         lambda i: (0, 0, 0)),
            pl.BlockSpec((HIDDEN_DIM, NUM_HIDDEN_LAYERS - 1), lambda i: (0, 0)),
            pl.BlockSpec((HIDDEN_DIM, OUTPUT_DIM), lambda i: (0, 0)),
            pl.BlockSpec((OUTPUT_DIM, 1), lambda i: (0, 0)),
        ],
        out_specs=pl.BlockSpec((OUTPUT_DIM, tb), lambda i: (0, i)),
        compiler_params=pltpu.CompilerParams(
            dimension_semantics=("parallel",)),
        cost_estimate=cost,
    )(x_t, w0, b0, wh_bf16, bh, wo, bo)

    return out_t[:, :batch] if b_pad != batch else out_t


def _mlp_forward_impl(x, w0, b0, wh, bh, wo, bo):
    """PyTorch-layout forward: x [batch, INPUT_DIM] -> [batch, OUTPUT_DIM]."""
    batch = x.shape[0]
    if batch == 0:
        return jnp.zeros((0, OUTPUT_DIM), jnp.float32)
    # TODO(synk): for large batches, prefer mlp_forward_feature_major with a
    # feature-major [3, B] input (or fuse this transpose into the producer) to
    # avoid the extra XLA transpose copy here.
    out_t = _forward_feature_major(x.T, w0, b0, wh, bh, wo, bo)
    return out_t.T  # [1, batch] -> [batch, 1] (layout-only)


mlp_forward = jax.jit(_mlp_forward_impl)
mlp_forward_feature_major = jax.jit(_forward_feature_major)


def init_params(key):
    """PyTorch-Linear-style init: U(-1/sqrt(fan_in), 1/sqrt(fan_in)).

    Weights are stored in the PyTorch [out, in] layout (kernel computes W @ h
    with batch on lanes); hidden biases are packed lane-dense as [32, L-1];
    the output weight is stored transposed [in, out] for the sublane reduce.
    """
    keys = jax.random.split(key, 2 * (NUM_HIDDEN_LAYERS + 1))

    def linear(kw, kb, fan_in, fan_out):
        bound = 1.0 / jnp.sqrt(float(fan_in))
        w = jax.random.uniform(kw, (fan_out, fan_in), jnp.float32, -bound, bound)
        b = jax.random.uniform(kb, (fan_out,), jnp.float32, -bound, bound)
        return w, b

    # Layer 0: input_dim -> hidden_dim
    w0, b0v = linear(keys[0], keys[1], INPUT_DIM, HIDDEN_DIM)     # [32,3], [32]
    b0 = b0v.reshape(HIDDEN_DIM, 1)                               # [32,1]

    # Hidden layers 1..7: hidden_dim -> hidden_dim
    wh_list, bh_cols = [], []
    for i in range(NUM_HIDDEN_LAYERS - 1):
        w, b = linear(keys[2 + 2 * i], keys[3 + 2 * i], HIDDEN_DIM, HIDDEN_DIM)
        wh_list.append(w)
        bh_cols.append(b)
    wh = jnp.stack(wh_list, axis=0)                               # [7, 32, 32]
    bh = jnp.stack(bh_cols, axis=1)                               # [32, 7]

    # Output layer: hidden_dim -> output_dim
    wo_full, bo_v = linear(keys[-2], keys[-1], HIDDEN_DIM, OUTPUT_DIM)  # [1,32], [1]
    wo = wo_full.T                                                # [32, 1]
    bo = bo_v.reshape(OUTPUT_DIM, 1)                              # [1, 1]

    return w0, b0, wh, bh, wo, bo


def reference_forward(x, w0, b0, wh, bh, wo, bo):
    """Pure-JAX reference with PyTorch Linear semantics (x @ W.T + b)."""
    h = jnp.maximum(x @ w0.T + b0[:, 0], 0.0)
    for i in range(NUM_HIDDEN_LAYERS - 1):
        h = jnp.maximum(h @ wh[i].T + bh[:, i], 0.0)
    return jax.nn.sigmoid(h @ wo + bo[:, 0])


if __name__ == "__main__":
    key = jax.random.PRNGKey(0)
    k_params, k_x1, k_x2 = jax.random.split(key, 3)
    params = init_params(k_params)

    # Tolerance reflects bf16 MXU operand rounding stacked across the 8 layers
    # (both the kernel and XLA's default-precision reference dot paths round
    # operands to bf16-level on TPU).
    ATOL = RTOL = 3e-3

    # Small shape consistent with the module (input_dim=3).
    batch = 8
    x = jax.random.normal(k_x1, (batch, INPUT_DIM), jnp.float32)
    out = jax.block_until_ready(mlp_forward(x, *params))
    ref = reference_forward(x, *params)
    assert out.shape == (batch, OUTPUT_DIM), out.shape
    assert jnp.allclose(out, ref, atol=ATOL, rtol=RTOL), \
        float(jnp.max(jnp.abs(out - ref)))

    # Larger batch exercises the 2-step grid and the paired 512-lane chunks.
    batch2 = 2048
    x2 = jax.random.normal(k_x2, (batch2, INPUT_DIM), jnp.float32)
    out2 = jax.block_until_ready(mlp_forward(x2, *params))
    ref2 = reference_forward(x2, *params)
    assert out2.shape == (batch2, OUTPUT_DIM), out2.shape
    assert jnp.allclose(out2, ref2, atol=ATOL, rtol=RTOL), \
        float(jnp.max(jnp.abs(out2 - ref2)))

    print("KERNEL_OK")
</pallas_src>

<mosaic_0001>
module attributes {stable_mosaic.version = 11 : i64} {
  func.func @kernel(%arg0: i32, %arg1: memref<3x128xf32, #tpu.memory_space<vmem>>, %arg2: memref<32x3xf32, #tpu.memory_space<vmem>>, %arg3: memref<32x1xf32, #tpu.memory_space<vmem>>, %arg4: memref<7x32x32xbf16, #tpu.memory_space<vmem>>, %arg5: memref<32x7xf32, #tpu.memory_space<vmem>>, %arg6: memref<32x1xf32, #tpu.memory_space<vmem>>, %arg7: memref<1x1xf32, #tpu.memory_space<vmem>>, %arg8: memref<1x128xf32, #tpu.memory_space<vmem>>) attributes {dimension_semantics = [#tpu.dimension_semantics<parallel>], iteration_bounds = array<i64: 1>, scalar_prefetch = 0 : i64, scratch_operands = 0 : i64, tpu.core_type = #tpu.core_type<tc>, window_params = [{transform_indices = @transform_0, window_bounds = array<i64: 3, 128>}, {pipeline_mode = #tpu.pipeline_mode<synchronous>, transform_indices = @transform_1, window_bounds = array<i64: 32, 3>}, {pipeline_mode = #tpu.pipeline_mode<synchronous>, transform_indices = @transform_2, window_bounds = array<i64: 32, 1>}, {pipeline_mode = #tpu.pipeline_mode<synchronous>, transform_indices = @transform_3, window_bounds = array<i64: 7, 32, 32>}, {pipeline_mode = #tpu.pipeline_mode<synchronous>, transform_indices = @transform_4, window_bounds = array<i64: 32, 7>}, {pipeline_mode = #tpu.pipeline_mode<synchronous>, transform_indices = @transform_5, window_bounds = array<i64: 32, 1>}, {pipeline_mode = #tpu.pipeline_mode<synchronous>, transform_indices = @transform_6, window_bounds = array<i64: 1, 1>}, {transform_indices = @transform_7, window_bounds = array<i64: 1, 128>}]} {
    %c0 = arith.constant 0 : index
    %c0_0 = arith.constant 0 : index
    %0 = vector.load %arg2[%c0, %c0_0] : memref<32x3xf32, #tpu.memory_space<vmem>>, vector<32x3xf32>
    %c0_1 = arith.constant 0 : index
    %c0_2 = arith.constant 0 : index
    %1 = vector.load %arg3[%c0_1, %c0_2] : memref<32x1xf32, #tpu.memory_space<vmem>>, vector<32x1xf32>
    %c0_3 = arith.constant 0 : index
    %c0_4 = arith.constant 0 : index
    %2 = vector.load %arg5[%c0_3, %c0_4] : memref<32x7xf32, #tpu.memory_space<vmem>>, vector<32x7xf32>
    %c0_5 = arith.constant 0 : index
    %c0_6 = arith.constant 0 : index
    %3 = vector.load %arg6[%c0_5, %c0_6] : memref<32x1xf32, #tpu.memory_space<vmem>>, vector<32x1xf32>
    %c0_7 = arith.constant 0 : index
    %c0_8 = arith.constant 0 : index
    %4 = vector.load %arg7[%c0_7, %c0_8] : memref<1x1xf32, #tpu.memory_space<vmem>>, vector<1x1xf32>
    %c0_9 = arith.constant 0 : index
    %c0_10 = arith.constant 0 : index
    %5 = vector.load %arg1[%c0_9, %c0_10] : memref<3x128xf32, #tpu.memory_space<vmem>>, vector<3x128xf32>
    %6 = vector.extract_strided_slice %0 {offsets = [0, 0], sizes = [32, 1], strides = [1, 1]} : vector<32x3xf32> to vector<32x1xf32>
    %7 = vector.extract_strided_slice %5 {offsets = [0, 0], sizes = [1, 128], strides = [1, 1]} : vector<3x128xf32> to vector<1x128xf32>
    %8 = vector.broadcast %6 : vector<32x1xf32> to vector<32x128xf32>
    %9 = vector.broadcast %7 : vector<1x128xf32> to vector<32x128xf32>
    %10 = arith.mulf %8, %9 : vector<32x128xf32>
    %11 = vector.extract_strided_slice %0 {offsets = [0, 1], sizes = [32, 1], strides = [1, 1]} : vector<32x3xf32> to vector<32x1xf32>
    %12 = vector.extract_strided_slice %5 {offsets = [1, 0], sizes = [1, 128], strides = [1, 1]} : vector<3x128xf32> to vector<1x128xf32>
    %13 = vector.broadcast %11 : vector<32x1xf32> to vector<32x128xf32>
    %14 = vector.broadcast %12 : vector<1x128xf32> to vector<32x128xf32>
    %15 = arith.mulf %13, %14 : vector<32x128xf32>
    %16 = arith.addf %10, %15 : vector<32x128xf32>
    %17 = vector.extract_strided_slice %0 {offsets = [0, 2], sizes = [32, 1], strides = [1, 1]} : vector<32x3xf32> to vector<32x1xf32>
    %18 = vector.extract_strided_slice %5 {offsets = [2, 0], sizes = [1, 128], strides = [1, 1]} : vector<3x128xf32> to vector<1x128xf32>
    %19 = vector.broadcast %17 : vector<32x1xf32> to vector<32x128xf32>
    %20 = vector.broadcast %18 : vector<1x128xf32> to vector<32x128xf32>
    %21 = arith.mulf %19, %20 : vector<32x128xf32>
    %22 = arith.addf %16, %21 : vector<32x128xf32>
    %23 = vector.broadcast %1 : vector<32x1xf32> to vector<32x128xf32>
    %24 = arith.addf %22, %23 : vector<32x128xf32>
    %cst = arith.constant 0.000000e+00 : f32
    %25 = vector.broadcast %cst : f32 to vector<32x128xf32>
    %26 = arith.maximumf %24, %25 : vector<32x128xf32>
    %c0_11 = arith.constant 0 : index
    %c0_12 = arith.constant 0 : index
    %c0_13 = arith.constant 0 : index
    %27 = vector.load %arg4[%c0_11, %c0_12, %c0_13] : memref<7x32x32xbf16, #tpu.memory_space<vmem>>, vector<1x32x32xbf16>
    %28 = vector.shape_cast %27 : vector<1x32x32xbf16> to vector<32x32xbf16>
    %29 = vector.extract_strided_slice %2 {offsets = [0, 0], sizes = [32, 1], strides = [1, 1]} : vector<32x7xf32> to vector<32x1xf32>
    %30 = arith.truncf %26 : vector<32x128xf32> to vector<32x128xbf16>
    %cst_14 = arith.constant dense<0.000000e+00> : vector<32x128xf32>
    %31 = tpu.matmul %28, %30, %cst_14 {dimension_numbers = #tpu.dot_dimension_numbers<[1], [0], [0], [1], [0, 0, 1, 1], [], []>} : vector<32x32xbf16>, vector<32x128xbf16>, vector<32x128xf32> -> vector<32x128xf32>
    %32 = vector.broadcast %29 : vector<32x1xf32> to vector<32x128xf32>
    %33 = arith.addf %31, %32 : vector<32x128xf32>
    %cst_15 = arith.constant 0.000000e+00 : f32
    %34 = vector.broadcast %cst_15 : f32 to vector<32x128xf32>
    %35 = arith.maximumf %33, %34 : vector<32x128xf32>
    %c1 = arith.constant 1 : index
    %c0_16 = arith.constant 0 : index
    %c0_17 = arith.constant 0 : index
    %36 = vector.load %arg4[%c1, %c0_16, %c0_17] : memref<7x32x32xbf16, #tpu.memory_space<vmem>>, vector<1x32x32xbf16>
    %37 = vector.shape_cast %36 : vector<1x32x32xbf16> to vector<32x32xbf16>
    %38 = vector.extract_strided_slice %2 {offsets = [0, 1], sizes = [32, 1], strides = [1, 1]} : vector<32x7xf32> to vector<32x1xf32>
    %39 = arith.truncf %35 : vector<32x128xf32> to vector<32x128xbf16>
    %cst_18 = arith.constant dense<0.000000e+00> : vector<32x128xf32>
    %40 = tpu.matmul %37, %39, %cst_18 {dimension_numbers = #tpu.dot_dimension_numbers<[1], [0], [0], [1], [0, 0, 1, 1], [], []>} : vector<32x32xbf16>, vector<32x128xbf16>, vector<32x128xf32> -> vector<32x128xf32>
    %41 = vector.broadcast %38 : vector<32x1xf32> to vector<32x128xf32>
    %42 = arith.addf %40, %41 : vector<32x128xf32>
    %cst_19 = arith.constant 0.000000e+00 : f32
    %43 = vector.broadcast %cst_19 : f32 to vector<32x128xf32>
    %44 = arith.maximumf %42, %43 : vector<32x128xf32>
    %c2 = arith.constant 2 : index
    %c0_20 = arith.constant 0 : index
    %c0_21 = arith.constant 0 : index
    %45 = vector.load %arg4[%c2, %c0_20, %c0_21] : memref<7x32x32xbf16, #tpu.memory_space<vmem>>, vector<1x32x32xbf16>
    %46 = vector.shape_cast %45 : vector<1x32x32xbf16> to vector<32x32xbf16>
    %47 = vector.extract_strided_slice %2 {offsets = [0, 2], sizes = [32, 1], strides = [1, 1]} : vector<32x7xf32> to vector<32x1xf32>
    %48 = arith.truncf %44 : vector<32x128xf32> to vector<32x128xbf16>
    %cst_22 = arith.constant dense<0.000000e+00> : vector<32x128xf32>
    %49 = tpu.matmul %46, %48, %cst_22 {dimension_numbers = #tpu.dot_dimension_numbers<[1], [0], [0], [1], [0, 0, 1, 1], [], []>} : vector<32x32xbf16>, vector<32x128xbf16>, vector<32x128xf32> -> vector<32x128xf32>
    %50 = vector.broadcast %47 : vector<32x1xf32> to vector<32x128xf32>
    %51 = arith.addf %49, %50 : vector<32x128xf32>
    %cst_23 = arith.constant 0.000000e+00 : f32
    %52 = vector.broadcast %cst_23 : f32 to vector<32x128xf32>
    %53 = arith.maximumf %51, %52 : vector<32x128xf32>
    %c3 = arith.constant 3 : index
    %c0_24 = arith.constant 0 : index
    %c0_25 = arith.constant 0 : index
    %54 = vector.load %arg4[%c3, %c0_24, %c0_25] : memref<7x32x32xbf16, #tpu.memory_space<vmem>>, vector<1x32x32xbf16>
    %55 = vector.shape_cast %54 : vector<1x32x32xbf16> to vector<32x32xbf16>
    %56 = vector.extract_strided_slice %2 {offsets = [0, 3], sizes = [32, 1], strides = [1, 1]} : vector<32x7xf32> to vector<32x1xf32>
    %57 = arith.truncf %53 : vector<32x128xf32> to vector<32x128xbf16>
    %cst_26 = arith.constant dense<0.000000e+00> : vector<32x128xf32>
    %58 = tpu.matmul %55, %57, %cst_26 {dimension_numbers = #tpu.dot_dimension_numbers<[1], [0], [0], [1], [0, 0, 1, 1], [], []>} : vector<32x32xbf16>, vector<32x128xbf16>, vector<32x128xf32> -> vector<32x128xf32>
    %59 = vector.broadcast %56 : vector<32x1xf32> to vector<32x128xf32>
    %60 = arith.addf %58, %59 : vector<32x128xf32>
    %cst_27 = arith.constant 0.000000e+00 : f32
    %61 = vector.broadcast %cst_27 : f32 to vector<32x128xf32>
    %62 = arith.maximumf %60, %61 : vector<32x128xf32>
    %c4 = arith.constant 4 : index
    %c0_28 = arith.constant 0 : index
    %c0_29 = arith.constant 0 : index
    %63 = vector.load %arg4[%c4, %c0_28, %c0_29] : memref<7x32x32xbf16, #tpu.memory_space<vmem>>, vector<1x32x32xbf16>
    %64 = vector.shape_cast %63 : vector<1x32x32xbf16> to vector<32x32xbf16>
    %65 = vector.extract_strided_slice %2 {offsets = [0, 4], sizes = [32, 1], strides = [1, 1]} : vector<32x7xf32> to vector<32x1xf32>
    %66 = arith.truncf %62 : vector<32x128xf32> to vector<32x128xbf16>
    %cst_30 = arith.constant dense<0.000000e+00> : vector<32x128xf32>
    %67 = tpu.matmul %64, %66, %cst_30 {dimension_numbers = #tpu.dot_dimension_numbers<[1], [0], [0], [1], [0, 0, 1, 1], [], []>} : vector<32x32xbf16>, vector<32x128xbf16>, vector<32x128xf32> -> vector<32x128xf32>
    %68 = vector.broadcast %65 : vector<32x1xf32> to vector<32x128xf32>
    %69 = arith.addf %67, %68 : vector<32x128xf32>
    %cst_31 = arith.constant 0.000000e+00 : f32
    %70 = vector.broadcast %cst_31 : f32 to vector<32x128xf32>
    %71 = arith.maximumf %69, %70 : vector<32x128xf32>
    %c5 = arith.constant 5 : index
    %c0_32 = arith.constant 0 : index
    %c0_33 = arith.constant 0 : index
    %72 = vector.load %arg4[%c5, %c0_32, %c0_33] : memref<7x32x32xbf16, #tpu.memory_space<vmem>>, vector<1x32x32xbf16>
    %73 = vector.shape_cast %72 : vector<1x32x32xbf16> to vector<32x32xbf16>
    %74 = vector.extract_strided_slice %2 {offsets = [0, 5], sizes = [32, 1], strides = [1, 1]} : vector<32x7xf32> to vector<32x1xf32>
    %75 = arith.truncf %71 : vector<32x128xf32> to vector<32x128xbf16>
    %cst_34 = arith.constant dense<0.000000e+00> : vector<32x128xf32>
    %76 = tpu.matmul %73, %75, %cst_34 {dimension_numbers = #tpu.dot_dimension_numbers<[1], [0], [0], [1], [0, 0, 1, 1], [], []>} : vector<32x32xbf16>, vector<32x128xbf16>, vector<32x128xf32> -> vector<32x128xf32>
    %77 = vector.broadcast %74 : vector<32x1xf32> to vector<32x128xf32>
    %78 = arith.addf %76, %77 : vector<32x128xf32>
    %cst_35 = arith.constant 0.000000e+00 : f32
    %79 = vector.broadcast %cst_35 : f32 to vector<32x128xf32>
    %80 = arith.maximumf %78, %79 : vector<32x128xf32>
    %c6 = arith.constant 6 : index
    %c0_36 = arith.constant 0 : index
    %c0_37 = arith.constant 0 : index
    %81 = vector.load %arg4[%c6, %c0_36, %c0_37] : memref<7x32x32xbf16, #tpu.memory_space<vmem>>, vector<1x32x32xbf16>
    %82 = vector.shape_cast %81 : vector<1x32x32xbf16> to vector<32x32xbf16>
    %83 = vector.extract_strided_slice %2 {offsets = [0, 6], sizes = [32, 1], strides = [1, 1]} : vector<32x7xf32> to vector<32x1xf32>
    %84 = arith.truncf %80 : vector<32x128xf32> to vector<32x128xbf16>
    %cst_38 = arith.constant dense<0.000000e+00> : vector<32x128xf32>
    %85 = tpu.matmul %82, %84, %cst_38 {dimension_numbers = #tpu.dot_dimension_numbers<[1], [0], [0], [1], [0, 0, 1, 1], [], []>} : vector<32x32xbf16>, vector<32x128xbf16>, vector<32x128xf32> -> vector<32x128xf32>
    %86 = vector.broadcast %83 : vector<32x1xf32> to vector<32x128xf32>
    %87 = arith.addf %85, %86 : vector<32x128xf32>
    %cst_39 = arith.constant 0.000000e+00 : f32
    %88 = vector.broadcast %cst_39 : f32 to vector<32x128xf32>
    %89 = arith.maximumf %87, %88 : vector<32x128xf32>
    %90 = vector.broadcast %3 : vector<32x1xf32> to vector<32x128xf32>
    %91 = arith.mulf %89, %90 : vector<32x128xf32>
    %cst_40 = arith.constant dense<0.000000e+00> : vector<128xf32>
    %92 = vector.multi_reduction <add>, %91, %cst_40 [0] : vector<32x128xf32> to vector<128xf32>
    %93 = vector.shape_cast %92 : vector<128xf32> to vector<1x128xf32>
    %94 = vector.broadcast %4 : vector<1x1xf32> to vector<1x128xf32>
    %95 = arith.addf %93, %94 : vector<1x128xf32>
    %96 = arith.negf %95 : vector<1x128xf32>
    %97 = math.exp %96 : vector<1x128xf32>
    %cst_41 = arith.constant 1.000000e+00 : f32
    %98 = vector.broadcast %cst_41 : f32 to vector<1x128xf32>
    %99 = arith.addf %98, %97 : vector<1x128xf32>
    %100 = arith.divf %98, %99 : vector<1x128xf32>
    %c0_42 = arith.constant 0 : index
    %c0_43 = arith.constant 0 : index
    %101 = vector.load %arg8[%c0_42, %c0_43] : memref<1x128xf32, #tpu.memory_space<vmem>>, vector<1x128xf32>
    tpu.vector_store %arg8[%c0_42, %c0_43], %100 {strides = array<i32>} : memref<1x128xf32, #tpu.memory_space<vmem>>, vector<1x128xf32>,
    return
  }
  func.func @transform_0(%arg0: i32) -> (i32, i32) {
    %c0_i32 = arith.constant 0 : i32
    %c0_i32_0 = arith.constant 0 : i32
    return %c0_i32, %arg0 : i32, i32
  }
  func.func @transform_1(%arg0: i32) -> (i32, i32) {
    %c0_i32 = arith.constant 0 : i32
    %c0_i32_0 = arith.constant 0 : i32
    %c0_i32_1 = arith.constant 0 : i32
    return %c0_i32, %c0_i32_0 : i32, i32
  }
  func.func @transform_2(%arg0: i32) -> (i32, i32) {
    %c0_i32 = arith.constant 0 : i32
    %c0_i32_0 = arith.constant 0 : i32
    %c0_i32_1 = arith.constant 0 : i32
    return %c0_i32, %c0_i32_0 : i32, i32
  }
  func.func @transform_3(%arg0: i32) -> (i32, i32, i32) {
    %c0_i32 = arith.constant 0 : i32
    %c0_i32_0 = arith.constant 0 : i32
    %c0_i32_1 = arith.constant 0 : i32
    %c0_i32_2 = arith.constant 0 : i32
    return %c0_i32, %c0_i32_0, %c0_i32_1 : i32, i32, i32
  }
  func.func @transform_4(%arg0: i32) -> (i32, i32) {
    %c0_i32 = arith.constant 0 : i32
    %c0_i32_0 = arith.constant 0 : i32
    %c0_i32_1 = arith.constant 0 : i32
    return %c0_i32, %c0_i32_0 : i32, i32
  }
  func.func @transform_5(%arg0: i32) -> (i32, i32) {
    %c0_i32 = arith.constant 0 : i32
    %c0_i32_0 = arith.constant 0 : i32
    %c0_i32_1 = arith.constant 0 : i32
    return %c0_i32, %c0_i32_0 : i32, i32
  }
  func.func @transform_6(%arg0: i32) -> (i32, i32) {
    %c0_i32 = arith.constant 0 : i32
    %c0_i32_0 = arith.constant 0 : i32
    %c0_i32_1 = arith.constant 0 : i32
    return %c0_i32, %c0_i32_0 : i32, i32
  }
  func.func @transform_7(%arg0: i32) -> (i32, i32) {
    %c0_i32 = arith.constant 0 : i32
    %c0_i32_0 = arith.constant 0 : i32
    return %c0_i32, %arg0 : i32, i32
  }
}

</mosaic_0001>

<bundles_post_ra>
// kernel: _mlp_forward_impl.1
= control target key start
LH: loop header
LB: loop body
LE: loop exit
PB: predicated region body
PF: predicated region fallthrough
CT: control target
= control target key end

     0   :  { %v1045_v0 = vmov 2   ;;  %v1046_v1 = vmov 1   ;;  %v1047_v5 = vmov 0   ;;  %vm195_vm0 = vcmask 261120   ;;  %s1255_s1 = inlined_call_operand.vmem [shape: f32[32,3], index: 1, kind: input, shape index: {}]   ;;  %s1256_s2 = inlined_call_operand.vmem [shape: f32[32,1], index: 2, kind: input, shape index: {}]   ;;  %s1257_s4 = inlined_call_operand.vmem [shape: f32[32,7], index: 4, kind: input, shape index: {}]   ;;  %s1258_s3 = inlined_call_operand.vmem [shape: bf16[7,32,32], index: 3, kind: input, shape index: {}]   ;;  %s1259_s0 = inlined_call_operand.vmem [shape: f32[3,128], index: 0, kind: input, shape index: {}]   ;;  %s1260_s6 = inlined_call_operand.<no memory space> [shape: f32[1,1], index: 6, kind: input, shape index: {}]   ;;  %s1261_s5 = inlined_call_operand.vmem [shape: f32[32,1], index: 5, kind: input, shape index: {}]   ;;  %s1262_s7 = inlined_call_operand.vmem [shape: f32[1,128], index: 7, kind: output, shape index: {}]  }
   0x1   :  { %1006 = vset.pattern.permute.xlu0 %v1045_v0  ;;  %1005 = vset.pattern.permute.xlu1 %v1046_v1  ;;  %v29_v2 = vld [vmem:[%s1255_s1] sm:$0xff]  ;;  %v31_v3 = vld [vmem:[%s1255_s1 + $0x10] sm:$0xff]  ;;  %v30_v4 = vld [vmem:[%s1255_s1 + $0x8] sm:$0xff]  ;;  %v67_v21 = vlaneseq }
   0x2   :  { %104 = vperm.xlu0 %1006, %v29_v2   ;;  %76 = vperm.xlu1 %1005, %v29_v2   ;;  %v32_v6 = vld [vmem:[%s1255_s1 + $0x18] sm:$0xff]  ;;  %v34_v7 = vld [vmem:[%s1256_s2 + $0x8] sm:$0xff]  ;;  %v1112_v8 = vld [vmem:[%s1257_s4] sm:$0xff] }
   0x3   :  { %v1118_v9 = vld [vmem:[%s1257_s4 + $0x10] sm:$0xff]  ;;  %v33_v10 = vld [vmem:[%s1256_s2] sm:$0xff]  ;;  %v1132_v12 = vld [vmem:[%s1257_s4 + $0x18] sm:$0xff]  ;;  %v1155_v23 = vshrl.u32 %v67_v21, 7 }
   0x4   :  { %v35_v11 = vld [vmem:[%s1256_s2 + $0x10] sm:$0xff]  ;;  %v36_v13 = vld [vmem:[%s1256_s2 + $0x18] sm:$0xff]  ;;  %v1141_v14 = vld [vmem:[%s1257_s4 + $0x8] sm:$0xff] }
   0x5   :  { %v1027_v15 = vld [vmem:[%s1258_s3] sm:$0xff]   ;;  %v69_v25 = vsub.s32 0, %v1155_v23  ;;  %v93_v27 = vsub.s32 1, %v1155_v23  ;;  %v121_v30 = vsub.s32 2, %v1155_v23 }
   0x6   :  { %112 = vperm.xlu0 %1006, %v31_v3   ;;  %80 = vperm.xlu1 %1005, %v30_v4   ;;  %v46_v28 = vld [vmem:[%s1259_s0] sm:$0x7] }
   0x7   :  { %946 = vmatprep.mubr.msk.bf16.mxu0 %vm195_vm0, %v1027_v15  ;;  %v70_v31 = vrot.slane %v46_v28, %v69_v25  ;;  %v94_v32 = vrot.slane %v46_v28, %v93_v27  ;;  %v122_v36 = vrot.slane %v46_v28, %v121_v30 }
   0xa   :  { %1010 = vset.pattern.permute.xlu0 %v1047_v5  ;;  %1007 = vset.pattern.permute.xlu1 %v1045_v0 }
   0xb   :  { %49 = vperm.xlu0 %1010, %v29_v2   ;;  %108 = vperm.xlu1 %1007, %v30_v4  }
   0xf   :  { %54 = vperm.xlu0 %1010, %v30_v4   ;;  %1008 = vset.pattern.permute.xlu1 %v1047_v5 }
  0x10   :  { %59 = vperm.xlu1 %1008, %v31_v3  }
  0x13   :  { %64 = vperm.xlu0 %1010, %v32_v6  }
  0x14   :  { %1009 = vset.pattern.permute.xlu1 %v1046_v1 }
  0x15   :  { %84 = vperm.xlu1 %1009, %v31_v3  }
  0x17   :  { %138 = vperm.xlu0 %1010, %v34_v7  }
  0x19   :  { %88 = vperm.xlu1 %1009, %v32_v6  }
  0x1b   :  { %167 = vperm.xlu0 %1010, %v1112_v8  }
  0x1d   :  { %1011 = vset.pattern.permute.xlu1 %v1045_v0 }
  0x1e   :  { %116 = vperm.xlu1 %1011, %v32_v6  }
  0x1f   :  { %177 = vperm.xlu0 %1010, %v1118_v9  }
  0x22   :  { %1012 = vset.pattern.permute.xlu1 %v1047_v5 }
  0x23   :  { %133 = vperm.xlu1 %1012, %v33_v10   ;;  %1013 = vset.pattern.permute.xlu0 %v1046_v1  ;;  %v1028_v10 = vld [vmem:[%s1258_s3 + $0x8] sm:$0xff]  }
  0x24   :  { %263 = vperm.xlu0 %1013, %v1112_v8  }
  0x27   :  { %143 = vperm.xlu1 %1012, %v35_v11   ;;  %v1029_v11 = vld [vmem:[%s1258_s3 + $0x10] sm:$0xff]  }
  0x28   :  { %275 = vperm.xlu0 %1013, %v1132_v12   ;;  %954 = vmatprep.mubr.msk.bf16.mxu1 %vm195_vm0, %v1029_v11 }
  0x2b   :  { %148 = vperm.xlu1 %1012, %v36_v13  }
  0x2c   :  { %1016 = vset.pattern.permute.xlu0 %v1045_v0 }
  0x2d   :  { %359 = vperm.xlu0 %1016, %v1141_v14  }
  0x2f   :  { %172 = vperm.xlu1 %1012, %v1141_v14  }
  0x33   :  { %182 = vperm.xlu1 %1012, %v1132_v12  }
  0x37   :  { %1014 = vset.pattern.permute.xlu1 %v1046_v1 }
  0x38   :  { %267 = vperm.xlu1 %1014, %v1141_v14  }
  0x3c   :  { %271 = vperm.xlu1 %1014, %v1118_v9  }
  0x40   :  { %1015 = vset.pattern.permute.xlu1 %v1045_v0 }
  0x41   :  { %355 = vperm.xlu1 %1015, %v1112_v8  }
  0x45   :  { %363 = vperm.xlu1 %1015, %v1118_v9  }
  0x49   :  { %367 = vperm.xlu1 %1015, %v1132_v12  }
  0x81   :  { %v77_v16 = vpop.permute.xlu1 %76  ;;  %v105_v17 = vpop.permute.xlu0 %104 }
  0x82   :  { %v95_v39 = vmul.f32 %v94_v32, %v77_v16  ;;  %v123_v41 = vmul.f32 %v122_v36, %v105_v17 }
  0x85   :  { %v81_v18 = vpop.permute.xlu1 %80  ;;  %v113_v19 = vpop.permute.xlu0 %112 }
  0x86   :  { %v96_v37 = vmul.f32 %v94_v32, %v81_v18  ;;  %v125_v56 = vmul.f32 %v122_v36, %v113_v19 }
  0x8a   :  { %v109_v20 = vpop.permute.xlu1 %108  ;;  %v50_v22 = vpop.permute.xlu0 %49 }
  0x8b   :  { %v71_v38 = vmul.f32 %v70_v31, %v50_v22  ;;  %v124_v43 = vmul.f32 %v122_v36, %v109_v20 }
  0x8d   :  { %v99_v42 = vadd.f32 %v95_v39, %v71_v38 }
  0x8e   :  { %v55_v26 = vpop.permute.xlu0 %54 }
  0x8f   :  { %v60_v24 = vpop.permute.xlu1 %59  ;;  %v72_v33 = vmul.f32 %v70_v31, %v55_v26  ;;  %v127_v50 = vadd.f32 %v123_v41, %v99_v42 }
  0x90   :  { %v73_v48 = vmul.f32 %v70_v31, %v60_v24 }
  0x91   :  { %v100_v40 = vadd.f32 %v96_v37, %v72_v33 }
  0x92   :  { %v65_v34 = vpop.permute.xlu0 %64 }
  0x93   :  { %v128_v47 = vadd.f32 %v124_v43, %v100_v40  ;;  %v74_v52 = vmul.f32 %v70_v31, %v65_v34  ;;  %v1030_v34 = vld [vmem:[%s1258_s3 + $0x18] sm:$0xff]  }
  0x94   :  { %v85_v29 = vpop.permute.xlu1 %84 }
  0x95   :  { %v97_v46 = vmul.f32 %v94_v32, %v85_v29 }
  0x96   :  { %v139_v45 = vpop.permute.xlu0 %138 }
  0x97   :  { %v152_v49 = vadd.f32 %v139_v45, %v128_v47  ;;  %v101_v53 = vadd.f32 %v97_v46, %v73_v48 }
  0x98   :  { %v89_v35 = vpop.permute.xlu1 %88 }
  0x99   :  { %v98_v54 = vmul.f32 %v94_v32, %v89_v35  ;;  %v156_v57 = vmax.f32 %v152_v49, 0.0  ;;  %v129_v62 = vadd.f32 %v125_v56, %v101_v53  ;;  %v1031_v35 = vld [vmem:[%s1258_s3 + $0x20] sm:$0xff]   ;;  %v1048_v56 = vmov 3  }
  0x9a   :  { %v168_v13 = vpop.permute.xlu0 %167  ;;  %1018 = vset.pattern.permute.xlu1 %v1048_v56  ;;  %1017 = vset.pattern.permute.xlu0 %v1048_v56 }
  0x9b   :  { %v102_v61 = vadd.f32 %v98_v54, %v74_v52  ;;  %v1032_v54 = vld [vmem:[%s1258_s3 + $0x28] sm:$0xff]   ;;  %451 = vperm.xlu1 %1018, %v1141_v14   ;;  %447 = vperm.xlu0 %1017, %v1112_v8  }
  0x9d   :  { %v117_v44 = vpop.permute.xlu1 %116 }
  0x9e   :  { %v126_v58 = vmul.f32 %v122_v36, %v117_v44  ;;  %v178_v16 = vpop.permute.xlu0 %177 }
  0x9f   :  { %455 = vperm.xlu1 %1018, %v1118_v9   ;;  %459 = vperm.xlu0 %1017, %v1132_v12  }
  0xa0   :  { %v130_v1 = vadd.f32 %v126_v58, %v102_v61 }
  0xa2   :  { %v134_v51 = vpop.permute.xlu1 %133 }
  0xa3   :  { %v151_v55 = vadd.f32 %v134_v51, %v127_v50  ;;  %v264_v37 = vpop.permute.xlu0 %263 }
  0xa5   :  { %v155_v59 = vmax.f32 %v151_v55, 0.0  ;;  %v1033_v55 = vld [vmem:[%s1258_s3 + $0x30] sm:$0xff]  }
  0xa6   :  { %v144_v60 = vpop.permute.xlu1 %143 }
  0xa7   :  { %v163_v63 = vpack.c.bf16 %v156_v57, %v155_v59  ;;  %v153_v0 = vadd.f32 %v144_v60, %v129_v62  ;;  %v276_v40 = vpop.permute.xlu0 %275 }
  0xa9   :  { %942 = vmatprep.subr.bf16.mxu0 %v163_v63  ;;  %v157_v4 = vmax.f32 %v153_v0, 0.0 }
  0xaa   :  { %v149_v2 = vpop.permute.xlu1 %148  ;;  %943 = vmatpush3.bf16.msra.mxu0 %v163_v63 }
  0xab   :  { %v154_v3 = vadd.f32 %v149_v2, %v130_v1 }
  0xac   :  { %v360_v62 = vpop.permute.xlu0 %359 }
  0xad   :  { %v158_v6 = vmax.f32 %v154_v3, 0.0 }
  0xae   :  { %v173_v15 = vpop.permute.xlu1 %172 }
  0xaf   :  { %v164_v7 = vpack.c.bf16 %v158_v6, %v157_v4 }
  0xb1   :  { %944 = vmatprep.subr.bf16.mxu0 %v164_v7 }
  0xb2   :  { %945 = vmatpush3.bf16.msra.mxu0 %v164_v7  ;;  %v183_v20 = vpop.permute.xlu1 %182 }
  0xb5   :  { %947 = vmatmul.mubr.msk.bf16.vlgmr.msra.gmra.mrb[0].mxu0 %vm195_vm0, %v1028_v10 }
  0xb6   :  { %962 = vmatprep.mubr.msk.bf16.mxu0 %vm195_vm0, %v1031_v35 }
  0xb7   :  { %v268_v36 = vpop.permute.xlu1 %267 }
  0xbb   :  { %v272_v38 = vpop.permute.xlu1 %271 }
  0xc0   :  { %v356_v57 = vpop.permute.xlu1 %355 }
  0xc4   :  { %v364_v58 = vpop.permute.xlu1 %363 }
  0xc8   :  { %v368_v63 = vpop.permute.xlu1 %367 }
 0x188   :  { %v948_v17 = vpop.f32.mrb[0].mxu0 }
 0x189   :  { %v245_v18 = vadd.f32 %v948_v17, %v178_v16  ;;  %v236_v19 = vpop.f32.mrb[1].mxu0  ;;  %v1034_v16 = vld [vmem:[%s1258_s3 + $0x38] sm:$0xff]   ;;  %v1035_v17 = vld [vmem:[%s1258_s3 + $0x40] sm:$0xff]  }
 0x18a   :  { %v237_v21 = vadd.f32 %v236_v19, %v168_v13  ;;  %v949_v22 = vpop.f32.mrb[2].mxu0  ;;  %v452_v19 = vpop.permute.xlu1 %451 }
 0x18b   :  { %v248_v24 = vadd.f32 %v949_v22, %v183_v20  ;;  %v239_v26 = vpop.f32.mrb[3].mxu0  ;;  %v253_v28 = vmax.f32 %v245_v18, 0.0  ;;  %v1049_v18 = vmov 4   ;;  %v448_v20 = vpop.permute.xlu0 %447 }
 0x18c   :  { %v240_v27 = vadd.f32 %v239_v26, %v173_v15  ;;  %v251_v30 = vmax.f32 %v237_v21, 0.0  ;;  %1019 = vset.pattern.permute.xlu1 %v1049_v18  ;;  %1020 = vset.pattern.permute.xlu0 %v1049_v18 }
 0x18d   :  { %v254_v29 = vmax.f32 %v248_v24, 0.0  ;;  %539 = vperm.xlu1 %1019, %v1112_v8   ;;  %543 = vperm.xlu0 %1020, %v1141_v14  }
 0x18e   :  { %v252_v31 = vmax.f32 %v240_v27, 0.0  ;;  %v456_v21 = vpop.permute.xlu1 %455 }
 0x18f   :  { %v261_v32 = vpack.c.bf16 %v254_v29, %v253_v28  ;;  %v460_v24 = vpop.permute.xlu0 %459 }
 0x190   :  { %v260_v33 = vpack.c.bf16 %v252_v31, %v251_v30 }
 0x191   :  { %547 = vperm.xlu1 %1019, %v1118_v9  }
 0x192   :  { %950 = vmatprep.subr.bf16.mxu1 %v260_v33 }
 0x193   :  { %951 = vmatpush3.bf16.msra.mxu1 %v260_v33 }
 0x194   :  { %952 = vmatprep.subr.bf16.mxu1 %v261_v32 }
 0x195   :  { %551 = vperm.xlu1 %1019, %v1132_v12  }
 0x197   :  { %953 = vmatpush3.bf16.msra.mxu1 %v261_v32 }
 0x19a   :  { %955 = vmatmul.mubr.msk.bf16.vlgmr.msra.gmra.mrb[0].mxu1 %vm195_vm0, %v1030_v34 }
 0x19b   :  { %970 = vmatprep.mubr.msk.bf16.mxu1 %vm195_vm0, %v1033_v55 }
 0x26d   :  { %v956_v39 = vpop.f32.mrb[0].mxu1 }
 0x26e   :  { %v337_v41 = vadd.f32 %v956_v39, %v272_v38  ;;  %v328_v42 = vpop.f32.mrb[1].mxu1  ;;  %v1036_v39 = vld [vmem:[%s1258_s3 + $0x48] sm:$0xff]  }
 0x26f   :  { %v329_v43 = vadd.f32 %v328_v42, %v264_v37  ;;  %v957_v44 = vpop.f32.mrb[2].mxu1  ;;  %v540_v42 = vpop.permute.xlu1 %539 }
 0x270   :  { %v340_v45 = vadd.f32 %v957_v44, %v276_v40  ;;  %v331_v46 = vpop.f32.mrb[3].mxu1  ;;  %v345_v48 = vmax.f32 %v337_v41, 0.0  ;;  %v1037_v40 = vld [vmem:[%s1258_s3 + $0x50] sm:$0xff]   ;;  %v1050_v41 = vmov 5  }
 0x271   :  { %v332_v47 = vadd.f32 %v331_v46, %v268_v36  ;;  %v343_v50 = vmax.f32 %v329_v43, 0.0  ;;  %1022 = vset.pattern.permute.xlu1 %v1050_v41  ;;  %1021 = vset.pattern.permute.xlu0 %v1050_v41 }
 0x272   :  { %v346_v49 = vmax.f32 %v340_v45, 0.0  ;;  %635 = vperm.xlu1 %1022, %v1141_v14   ;;  %631 = vperm.xlu0 %1021, %v1112_v8  }
 0x273   :  { %v344_v51 = vmax.f32 %v332_v47, 0.0  ;;  %v548_v43 = vpop.permute.xlu1 %547  ;;  %v544_v47 = vpop.permute.xlu0 %543 }
 0x274   :  { %v353_v52 = vpack.c.bf16 %v346_v49, %v345_v48 }
 0x275   :  { %v352_v53 = vpack.c.bf16 %v344_v51, %v343_v50 }
 0x276   :  { %639 = vperm.xlu1 %1022, %v1118_v9   ;;  %643 = vperm.xlu0 %1021, %v1132_v12  }
 0x277   :  { %958 = vmatprep.subr.bf16.mxu0 %v352_v53  ;;  %v552_v48 = vpop.permute.xlu1 %551 }
 0x278   :  { %959 = vmatpush3.bf16.msra.mxu0 %v352_v53 }
 0x279   :  { %960 = vmatprep.subr.bf16.mxu0 %v353_v52 }
 0x27c   :  { %961 = vmatpush3.bf16.msra.mxu0 %v353_v52 }
 0x27f   :  { %963 = vmatmul.mubr.msk.bf16.vlgmr.msra.gmra.mrb[4].mxu0 %vm195_vm0, %v1032_v54 }
 0x280   :  { %978 = vmatprep.mubr.msk.bf16.mxu0 %vm195_vm0, %v1035_v17 }
 0x352   :  { %v964_v59 = vpop.f32.mrb[4].mxu0 }
 0x353   :  { %v429_v60 = vadd.f32 %v964_v59, %v364_v58  ;;  %v420_v61 = vpop.f32.mrb[5].mxu0 }
 0x354   :  { %v421_v0 = vadd.f32 %v420_v61, %v356_v57  ;;  %v965_v1 = vpop.f32.mrb[6].mxu0  ;;  %v1039_v61 = vld [vmem:[%s1258_s3 + $0x60] sm:$0xff]  }
 0x355   :  { %v432_v2 = vadd.f32 %v965_v1, %v368_v63  ;;  %v423_v3 = vpop.f32.mrb[7].mxu0  ;;  %v437_v6 = vmax.f32 %v429_v60, 0.0  ;;  %v1038_v60 = vld [vmem:[%s1258_s3 + $0x58] sm:$0xff]   ;;  %v12_v63 = vstv %s1260_s6 }
 0x356   :  { %v424_v4 = vadd.f32 %v423_v3, %v360_v62  ;;  %v435_v10 = vmax.f32 %v421_v0, 0.0  ;;  %v1051_v62 = vmov 6   ;;  %13 = vst [vmem:[#allocation2] sm:$0x1] %v12_v63  ;;  %v41_v0 = vld [vmem:[%s1261_s5] sm:$0xff]  ;;  %v44_v1 = vld [vmem:[%s1261_s5 + $0x18] sm:$0xff]  ;;  %v632_v3 = vpop.permute.xlu0 %631 }
 0x357   :  { %v438_v7 = vmax.f32 %v432_v2, 0.0  ;;  %1023 = vset.pattern.permute.xlu1 %v1051_v62  ;;  %1024 = vset.pattern.permute.xlu0 %v1051_v62  ;;  %v636_v2 = vpop.permute.xlu1 %635 }
 0x358   :  { %v436_v11 = vmax.f32 %v424_v4, 0.0  ;;  %723 = vperm.xlu1 %1023, %v1112_v8   ;;  %727 = vperm.xlu0 %1024, %v1141_v14   ;;  %v42_v8 = vld [vmem:[%s1261_s5 + $0x8] sm:$0xff] }
 0x359   :  { %v445_v13 = vpack.c.bf16 %v438_v7, %v437_v6 }
 0x35a   :  { %v444_v15 = vpack.c.bf16 %v436_v11, %v435_v10 }
 0x35b   :  { %v640_v4 = vpop.permute.xlu1 %639 }
 0x35c   :  { %966 = vmatprep.subr.bf16.mxu1 %v444_v15  ;;  %731 = vperm.xlu1 %1023, %v1118_v9   ;;  %v43_v9 = vld [vmem:[%s1261_s5 + $0x10] sm:$0xff] }
 0x35d   :  { %967 = vmatpush3.bf16.msra.mxu1 %v444_v15  ;;  %1025 = vset.pattern.permute.xlu0 %v1047_v5  ;;  %v45_v14 = vld [vmem:[#allocation2] sm:$0x1] }
 0x35e   :  { %968 = vmatprep.subr.bf16.mxu1 %v445_v13  ;;  %809 = vperm.xlu0 %1025, %v41_v0  }
 0x360   :  { %735 = vperm.xlu1 %1023, %v1132_v12   ;;  %v644_v12 = vpop.permute.xlu0 %643 }
 0x361   :  { %969 = vmatpush3.bf16.msra.mxu1 %v445_v13 }
 0x362   :  { %824 = vperm.xlu0 %1025, %v44_v1  }
 0x364   :  { %971 = vmatmul.mubr.msk.bf16.vlgmr.msra.gmra.mrb[4].mxu1 %vm195_vm0, %v1034_v16  ;;  %1026 = vset.pattern.permute.xlu1 %v1047_v5 }
 0x365   :  { %986 = vmatprep.mubr.msk.bf16.mxu1 %vm195_vm0, %v1037_v40  ;;  %814 = vperm.xlu1 %1026, %v42_v8  }
 0x369   :  { %819 = vperm.xlu1 %1026, %v43_v9  }
 0x36d   :  { %842 = vperm.xlu1 %1026, %v45_v14  }
 0x437   :  { %v972_v22 = vpop.f32.mrb[4].mxu1 }
 0x438   :  { %v521_v26 = vadd.f32 %v972_v22, %v456_v21  ;;  %v512_v27 = vpop.f32.mrb[5].mxu1 }
 0x439   :  { %v513_v28 = vadd.f32 %v512_v27, %v448_v20  ;;  %v973_v29 = vpop.f32.mrb[6].mxu1 }
 0x43a   :  { %v524_v30 = vadd.f32 %v973_v29, %v460_v24  ;;  %v515_v31 = vpop.f32.mrb[7].mxu1  ;;  %v529_v33 = vmax.f32 %v521_v26, 0.0  ;;  %v1040_v24 = vld [vmem:[%s1258_s3 + $0x68] sm:$0xff]   ;;  %v724_v26 = vpop.permute.xlu1 %723 }
 0x43b   :  { %v516_v32 = vadd.f32 %v515_v31, %v452_v19  ;;  %v527_v35 = vmax.f32 %v513_v28, 0.0  ;;  %v728_v29 = vpop.permute.xlu0 %727 }
 0x43c   :  { %v530_v34 = vmax.f32 %v524_v30, 0.0 }
 0x43d   :  { %v528_v36 = vmax.f32 %v516_v32, 0.0 }
 0x43e   :  { %v537_v37 = vpack.c.bf16 %v530_v34, %v529_v33  ;;  %v732_v27 = vpop.permute.xlu1 %731 }
 0x43f   :  { %v536_v38 = vpack.c.bf16 %v528_v36, %v527_v35  ;;  %v810_v36 = vpop.permute.xlu0 %809 }
 0x441   :  { %974 = vmatprep.subr.bf16.mxu0 %v536_v38 }
 0x442   :  { %975 = vmatpush3.bf16.msra.mxu0 %v536_v38  ;;  %v736_v28 = vpop.permute.xlu1 %735 }
 0x443   :  { %976 = vmatprep.subr.bf16.mxu0 %v537_v37 }
 0x446   :  { %977 = vmatpush3.bf16.msra.mxu0 %v537_v37  ;;  %v815_v32 = vpop.permute.xlu1 %814 }
 0x449   :  { %979 = vmatmul.mubr.msk.bf16.vlgmr.msra.gmra.mrb[8].mxu0 %vm195_vm0, %v1036_v39 }
 0x44a   :  { %994 = vmatprep.mubr.msk.bf16.mxu0 %vm195_vm0, %v1039_v61 }
 0x51c   :  { %v980_v44 = vpop.f32.mrb[8].mxu0 }
 0x51d   :  { %v613_v45 = vadd.f32 %v980_v44, %v548_v43  ;;  %v604_v46 = vpop.f32.mrb[9].mxu0 }
 0x51e   :  { %v605_v49 = vadd.f32 %v604_v46, %v540_v42  ;;  %v981_v50 = vpop.f32.mrb[10].mxu0  ;;  %v820_v46 = vpop.permute.xlu1 %819 }
 0x51f   :  { %v616_v51 = vadd.f32 %v981_v50, %v552_v48  ;;  %v607_v52 = vpop.f32.mrb[11].mxu0  ;;  %v621_v54 = vmax.f32 %v613_v45, 0.0 }
 0x520   :  { %v608_v53 = vadd.f32 %v607_v52, %v544_v47  ;;  %v619_v56 = vmax.f32 %v605_v49, 0.0  ;;  %v825_v47 = vpop.permute.xlu0 %824 }
 0x521   :  { %v622_v55 = vmax.f32 %v616_v51, 0.0 }
 0x522   :  { %v620_v57 = vmax.f32 %v608_v53, 0.0 }
 0x523   :  { %v629_v58 = vpack.c.bf16 %v622_v55, %v621_v54 }
 0x524   :  { %v628_v59 = vpack.c.bf16 %v620_v57, %v619_v56  ;;  %v843_v57 = vpop.permute.xlu1 %842 }
 0x526   :  { %982 = vmatprep.subr.bf16.mxu1 %v628_v59 }
 0x527   :  { %983 = vmatpush3.bf16.msra.mxu1 %v628_v59 }
 0x528   :  { %984 = vmatprep.subr.bf16.mxu1 %v629_v58 }
 0x52b   :  { %985 = vmatpush3.bf16.msra.mxu1 %v629_v58 }
 0x52e   :  { %987 = vmatmul.mubr.msk.bf16.vlgmr.msra.gmra.mrb[8].mxu1 %vm195_vm0, %v1038_v60  ;;  %v848_v60 = vrot.slane %v843_v57, %v69_v25 }
 0x601   :  { %v988_v6 = vpop.f32.mrb[8].mxu1 }
 0x602   :  { %v705_v7 = vadd.f32 %v988_v6, %v640_v4  ;;  %v696_v10 = vpop.f32.mrb[9].mxu1 }
 0x603   :  { %v697_v11 = vadd.f32 %v696_v10, %v632_v3  ;;  %v989_v13 = vpop.f32.mrb[10].mxu1 }
 0x604   :  { %v708_v15 = vadd.f32 %v989_v13, %v644_v12  ;;  %v699_v16 = vpop.f32.mrb[11].mxu1  ;;  %v713_v17 = vmax.f32 %v705_v7, 0.0 }
 0x605   :  { %v700_v5 = vadd.f32 %v699_v16, %v636_v2  ;;  %v711_v19 = vmax.f32 %v697_v11, 0.0 }
 0x606   :  { %v714_v18 = vmax.f32 %v708_v15, 0.0 }
 0x607   :  { %v712_v20 = vmax.f32 %v700_v5, 0.0 }
 0x608   :  { %v721_v21 = vpack.c.bf16 %v714_v18, %v713_v17 }
 0x609   :  { %v720_v22 = vpack.c.bf16 %v712_v20, %v711_v19 }
 0x60b   :  { %990 = vmatprep.subr.bf16.mxu0 %v720_v22 }
 0x60c   :  { %991 = vmatpush3.bf16.msra.mxu0 %v720_v22 }
 0x60d   :  { %992 = vmatprep.subr.bf16.mxu0 %v721_v21 }
 0x610   :  { %993 = vmatpush3.bf16.msra.mxu0 %v721_v21 }
 0x613   :  { %995 = vmatmul.mubr.msk.bf16.vlgmr.msra.gmra.mrb[12].mxu0 %vm195_vm0, %v1040_v24 }
 0x6e6   :  { %v996_v30 = vpop.f32.mrb[12].mxu0 }
 0x6e7   :  { %v788_v31 = vpop.f32.mrb[13].mxu0  ;;  %v797_v33 = vadd.f32 %v996_v30, %v732_v27 }
 0x6e8   :  { %v789_v34 = vadd.f32 %v788_v31, %v724_v26  ;;  %v997_v35 = vpop.f32.mrb[14].mxu0 }
 0x6e9   :  { %v791_v37 = vpop.f32.mrb[15].mxu0  ;;  %v800_v39 = vadd.f32 %v997_v35, %v736_v28  ;;  %v805_v41 = vmax.f32 %v797_v33, 0.0 }
 0x6ea   :  { %v803_v38 = vmax.f32 %v789_v34, 0.0  ;;  %v792_v40 = vadd.f32 %v791_v37, %v728_v29 }
 0x6eb   :  { %v806_v44 = vmax.f32 %v800_v39, 0.0  ;;  %v829_v48 = vmul.f32 %v820_v46, %v805_v41 }
 0x6ec   :  { %v804_v42 = vmax.f32 %v792_v40, 0.0  ;;  %v827_v43 = vmul.f32 %v810_v36, %v803_v38 }
 0x6ed   :  { %v830_v50 = vmul.f32 %v825_v47, %v806_v44 }
 0x6ee   :  { %v828_v45 = vmul.f32 %v815_v32, %v804_v42 }
 0x6f0   :  { %v831_v49 = vadd.f32 %v828_v45, %v827_v43 }
 0x6f2   :  { %v832_v51 = vadd.f32 %v831_v49, %v829_v48 }
 0x6f4   :  { %v833_v52 = vadd.f32 %v832_v51, %v830_v50 }
 0x6f6   :  { %v834_v53 = vrot.slane %v833_v52, 4 }
 0x6f8   :  { %v835_v54 = vadd.f32 %v834_v53, %v833_v52 }
 0x6fa   :  { %v836_v55 = vrot.slane %v835_v54, 2 }
 0x6fc   :  { %v837_v56 = vadd.f32 %v836_v55, %v835_v54 }
 0x6fe   :  { %v838_v58 = vrot.slane %v837_v56, 1 }
 0x700   :  { %v839_v59 = vadd.f32 %v838_v58, %v837_v56 }
 0x702   :  { %v849_v61 = vadd.f32 %v848_v60, %v839_v59 }
 0x704   :  { %v913_v62 = vmul.f32 -1.442695, %v849_v61 }
 0x706   :  { %1041 = vpow2.f32 %v913_v62 }
 0x710   :  { %v1042_v63 = vpop.eup %1041 }
 0x711   :  { %v853_v0 = vadd.f32 1.0, %v1042_v63 }
 0x713   :  { %1043 = vrcp.f32 %v853_v0 }
 0x71d   :  { %v1044_v1 = vpop.eup %1043 }
 0x71e   :  { %856 = vst [vmem:[%s1262_s7] sm:$0x1] %v1044_v1 }

</bundles_post_ra>
